<compile_context>
chip_gen: v6e
topology: v6e:2x2x1
jax: 0.10.0
libtpu: 0.0.40
codegen_flags: <defaults>
</compile_context>

<pallas_src>
import jax
import jax.numpy as jnp
from jax.experimental import pallas as pl
from jax.experimental.pallas import tpu as pltpu


def spatial_weight_kernel(x_ref, f_ref, o_ref):
    # x_ref : (TN, C, HW)  input tile (TN batch rows per grid step)
    # f_ref : (C, HW)      precomputed exp(log(a)*b*w) factor, VMEM-resident
    # o_ref : (TN, C, HW)
    o_ref[...] = (x_ref[...] * f_ref[...][None, :, :]).astype(o_ref.dtype)


def spatial_weight(inp, dist_map, exp_a, exp_b, *, tile_bytes=4 << 20):
    """Pallas implementation of SpatialWeight.forward.

    inp:      (N, C, H, W)
    dist_map: (Hd, Wd)
    exp_a:    (C, 1, 1)
    exp_b:    (C, 1, 1)
    """
    N, C, H, W = inp.shape

    # --- static crop branch (mirrors the torch module's shape glue) ---------
    if (H, W) != tuple(dist_map.shape):
        # NOTE: faithful to the torch code; fragile for even W / non-square
        # shapes (slice of size 2r+1 only equals W when W is odd).
        r = W // 2
        c = dist_map.shape[0] // 2
        weight = dist_map[c - r:c + r + 1, c - r:c + r + 1]
    else:
        weight = dist_map
    assert weight.shape == (H, W), "cropped dist_map must match input spatial size"

    HW = H * W

    # --- hoisted factor: exp(log(a)*b*w), shape (C, HW), computed once ------
    scale = (jnp.log(exp_a.astype(jnp.float32))
             * exp_b.astype(jnp.float32)).reshape(C, 1)          # (C, 1)
    factor = jnp.exp(scale * weight.astype(jnp.float32).reshape(1, HW))  # (C, HW)

    # --- lane-dense flattening ----------------------------------------------
    x = inp.reshape(N, C, HW)

    # --- batch tiling: target ~tile_bytes per input tile ---------------------
    itemsize = jnp.dtype(inp.dtype).itemsize
    row_bytes = C * HW * itemsize
    tn = max(1, min(N, tile_bytes // max(row_bytes, 1)))
    grid = (pl.cdiv(N, tn),)

    out = pl.pallas_call(
        spatial_weight_kernel,
        out_shape=jax.ShapeDtypeStruct((N, C, HW), inp.dtype),
        grid_spec=pltpu.PrefetchScalarGridSpec(
            num_scalar_prefetch=0,
            grid=grid,
            in_specs=[
                # streaming input tile: TN batch rows, full (C, HW) slab
                pl.BlockSpec((tn, C, HW), lambda n: (n, 0, 0)),
                # precomputed factor: constant index_map -> VMEM-resident
                pl.BlockSpec((C, HW), lambda n: (0, 0)),
            ],
            out_specs=pl.BlockSpec((tn, C, HW), lambda n: (n, 0, 0)),
        ),
        compiler_params=pltpu.CompilerParams(
            dimension_semantics=("parallel",)),
    )(x, factor)

    return out.reshape(N, C, H, W)


if __name__ == "__main__":
    key = jax.random.PRNGKey(0)
    k_inp, k_dm = jax.random.split(key)

    N, C, H, W = 2, 4, 16, 16
    inp = jax.random.normal(k_inp, (N, C, H, W), dtype=jnp.float32)
    # dist_map same spatial size as the input (non-crop branch, typical usage);
    # values in [0, 1] like a membership function.
    dist_map = jax.random.uniform(k_dm, (H, W), dtype=jnp.float32)

    # Deterministic parameter init, matching _init_parameter().
    exp_a = jnp.full((C, 1, 1), 0.85, dtype=jnp.float32)
    exp_b = jnp.full((C, 1, 1), 0.1, dtype=jnp.float32)

    out = spatial_weight(inp, dist_map, exp_a, exp_b)
    out = jax.block_until_ready(out)

    # Pure-JAX reference of the torch forward.
    ref = inp * jnp.exp(
        (jnp.log(exp_a) * exp_b)[None, :, :, :] * dist_map[None, None, :, :]
    )

    assert out.shape == (N, C, H, W)
    assert jnp.allclose(out, ref, atol=1e-6, rtol=1e-6), "mismatch vs reference"
    print("KERNEL_OK")
</pallas_src>

<mosaic_0001>
module attributes {stable_mosaic.version = 11 : i64} {
  func.func @spatial_weight_kernel(%arg0: i32, %arg1: memref<2x4x256xf32, #tpu.memory_space<vmem>>, %arg2: memref<4x256xf32, #tpu.memory_space<vmem>>, %arg3: memref<2x4x256xf32, #tpu.memory_space<vmem>>) attributes {dimension_semantics = [#tpu.dimension_semantics<parallel>], iteration_bounds = array<i64: 1>, scalar_prefetch = 0 : i64, scratch_operands = 0 : i64, tpu.core_type = #tpu.core_type<tc>, window_params = [{transform_indices = @transform_0, window_bounds = array<i64: 2, 4, 256>}, {pipeline_mode = #tpu.pipeline_mode<synchronous>, transform_indices = @transform_1, window_bounds = array<i64: 4, 256>}, {transform_indices = @transform_2, window_bounds = array<i64: 2, 4, 256>}]} {
    %c0 = arith.constant 0 : index
    %c0_0 = arith.constant 0 : index
    %c0_1 = arith.constant 0 : index
    %0 = vector.load %arg1[%c0, %c0_0, %c0_1] : memref<2x4x256xf32, #tpu.memory_space<vmem>>, vector<2x4x256xf32>
    %c0_2 = arith.constant 0 : index
    %c0_3 = arith.constant 0 : index
    %1 = vector.load %arg2[%c0_2, %c0_3] : memref<4x256xf32, #tpu.memory_space<vmem>>, vector<4x256xf32>
    %2 = vector.shape_cast %1 : vector<4x256xf32> to vector<1x4x256xf32>
    %3 = vector.broadcast %2 : vector<1x4x256xf32> to vector<2x4x256xf32>
    %4 = arith.mulf %0, %3 : vector<2x4x256xf32>
    %c0_4 = arith.constant 0 : index
    %c0_5 = arith.constant 0 : index
    %c0_6 = arith.constant 0 : index
    %5 = vector.load %arg3[%c0_4, %c0_5, %c0_6] : memref<2x4x256xf32, #tpu.memory_space<vmem>>, vector<2x4x256xf32>
    tpu.vector_store %arg3[%c0_4, %c0_5, %c0_6], %4 {strides = array<i32>} : memref<2x4x256xf32, #tpu.memory_space<vmem>>, vector<2x4x256xf32>,
    return
  }
  func.func @transform_0(%arg0: i32) -> (i32, i32, i32) {
    %c0_i32 = arith.constant 0 : i32
    %c0_i32_0 = arith.constant 0 : i32
    %c0_i32_1 = arith.constant 0 : i32
    return %arg0, %c0_i32, %c0_i32_0 : i32, i32, i32
  }
  func.func @transform_1(%arg0: i32) -> (i32, i32) {
    %c0_i32 = arith.constant 0 : i32
    %c0_i32_0 = arith.constant 0 : i32
    %c0_i32_1 = arith.constant 0 : i32
    return %c0_i32, %c0_i32_0 : i32, i32
  }
  func.func @transform_2(%arg0: i32) -> (i32, i32, i32) {
    %c0_i32 = arith.constant 0 : i32
    %c0_i32_0 = arith.constant 0 : i32
    %c0_i32_1 = arith.constant 0 : i32
    return %arg0, %c0_i32, %c0_i32_0 : i32, i32, i32
  }
}

</mosaic_0001>

<bundles_post_ra>
// kernel: tpu_custom_call.1
= control target key start
LH: loop header
LB: loop body
LE: loop exit
PB: predicated region body
PF: predicated region fallthrough
CT: control target
= control target key end

     0   :  { %7 = vsyncpa [#allocation3], 0  ;;  %s169_s0 = inlined_call_operand.hbm [shape: f32[2,4,256], index: 0, kind: input, shape index: {}]   ;;  %s170_s1 = inlined_call_operand.hbm [shape: f32[4,256], index: 1, kind: input, shape index: {}]   ;;  %s171_s2 = inlined_call_operand.hbm [shape: f32[2,4,256], index: 2, kind: output, shape index: {}]  }
   0x1   :  { %8 = vsyncpa [#allocation6], 0 }
   0x2   :  { %9 = vsyncpa [#allocation4], 0  ;;  %s134_s9 = smov [#allocation2]  }
   0x3   :  { %s15_s10 = sshll.u32 %s134_s9, 4  ;;  %s16_s10 = int_to_ptr.vmem [resolvable:$true] %s15_s10 }
   0x4   :  { %s76_s11 = scalar_lea.vmem %s16_s10, 256  ;;  %p81_p1 = scmp.lt.s32.totalorder %s16_s10, %s16_s10 }
   0x5   :  { %p77_p0 = scmp.ne.s32.totalorder %s16_s10, %s76_s11  ;;  %p82_p2 = scmp.lt.s32.totalorder %s76_s11, %s76_s11 }
   0x7   :  { %p83_p3 = por %p82_p2, %p81_p1 }
   0x9   :  { %p84_p4 = pnand %p83_p3, %p77_p0 }
   0xb   :  { %87 = shalt.err (!%p84_p4)
}
   0xc   :  { %s135_s12 = smov 128   ;;  %s136_s13 = smov 8  }
   0xd   :  { %21 = dma.hbm_to_vmem [thread:$0]  %s169_s0, 256, %s16_s10, [#allocation3], %s135_s12, %s135_s12, %s136_s13  }
   0xe   :  { %s137_s16 = smov [#allocation5]  }
   0xf   :  { %s28_s17 = sshll.u32 %s137_s16, 4  ;;  %s29_s17 = int_to_ptr.vmem [resolvable:$true] %s28_s17 }
  0x10   :  { %s96_s18 = scalar_lea.vmem %s29_s17, 128  ;;  %p101_p6 = scmp.lt.s32.totalorder %s29_s17, %s29_s17 }
  0x11   :  { %p97_p5 = scmp.ne.s32.totalorder %s29_s17, %s96_s18  ;;  %p102_p7 = scmp.lt.s32.totalorder %s96_s18, %s96_s18 }
  0x13   :  { %p103_p8 = por %p102_p7, %p101_p6 }
  0x15   :  { %p104_p9 = pnand %p103_p8, %p97_p5 }
  0x17   :  { %107 = shalt.err (!%p104_p9)
}
  0x18   :  { %31 = dma.hbm_to_vmem [thread:$0]  %s170_s1, 128, %s29_s17, [#allocation6]  }
  0x19   :  { %128 = dma.done.wait [#allocation3], 256  }
  0x1a   :  { %129 = vsyncadd [#allocation3], 4294967040 }
  0x1b   :  { %130 = dma.done.wait [#allocation6], 128  }
  0x1c   :  { %131 = vsyncadd [#allocation6], 4294967168  ;;  %s138_s21 = smov [#allocation7]   ;;  %v38_v0 = vld [vmem:[#allocation2] sm:$0xff]  ;;  %v40_v1 = vld [vmem:[#allocation5] sm:$0xff] }
  0x1d   :  { %s50_s0 = sshll.u32 %s138_s21, 4  ;;  %v39_v2 = vld [vmem:[#allocation2 + $0x8] sm:$0xff]  ;;  %v41_v3 = vmul.f32 %v40_v1, %v38_v0  ;;  %s51_s0 = int_to_ptr.vmem [resolvable:$true] %s50_s0 }
  0x1e   :  { %v42_v4 = vmul.f32 %v40_v1, %v39_v2  ;;  %s108_s22 = scalar_lea.vmem %s51_s0, 256  ;;  %p113_p11 = scmp.lt.s32.totalorder %s51_s0, %s51_s0 }
  0x1f   :  { %43 = vst [vmem:[#allocation7] sm:$0xff] %v41_v3  ;;  %p109_p10 = scmp.ne.s32.totalorder %s51_s0, %s108_s22  ;;  %p114_p12 = scmp.lt.s32.totalorder %s108_s22, %s108_s22 }
  0x20   :  { %44 = vst [vmem:[#allocation7 + $0x8] sm:$0xff] %v42_v4 }
  0x21   :  { %p115_p13 = por %p114_p12, %p113_p11 }
  0x23   :  { %p116_p0 = pnand %p115_p13, %p109_p10 }
  0x25   :  { %119 = shalt.err (!%p116_p0)
}
  0x26   :  { %56 = dma.vmem_to_hbm [thread:$0]  %s51_s0, 256, %s171_s2, [#allocation4], %s135_s12, %s135_s12, %s136_s13  }
  0x27   :  { %132 = dma.done.wait [#allocation4], 256  }
  0x28   :  { %133 = vsyncadd [#allocation4], 4294967040 }
  0x29   :  { %60 = vsyncpa [#allocation3], 1 }
  0x2a   :  { %61 = vsyncpa [#allocation6], 1 }
  0x2b   :  { %62 = vsyncpa [#allocation4], 1 }

</bundles_post_ra>
